<compile_context>
chip_gen: v7x
topology: tpu7x:2x2x1
jax: 0.10.0
libtpu: 0.0.40
codegen_flags: <defaults>
</compile_context>

<pallas_src>
import functools

import jax
import jax.numpy as jnp
from jax.experimental import pallas as pl
from jax.experimental.pallas import tpu as pltpu

DIL = 4  # dilation == padding of the 3x3 convs in SpatialGate


# ----------------------------- Pallas kernel ------------------------------- #

def _dilated_conv3x3_relu(h, w_ref, b_ref, mask_ref, W):
    """Dilated 3x3 conv (padding=dilation=DIL) + folded BN + ReLU.

    h: (Cr, N) activations (channels on sublanes, packed pixels on lanes).
    w_ref: (Cr, 9*Cr) im2col weights; b_ref: (Cr, 1); mask_ref: (9, N).
    Taps are circular lane rotations (pltpu.roll, XLU) masked at the image
    border / packed-image boundary; one fused MXU matmul handles all 9 taps.
    """
    Cr, N = h.shape
    taps = []
    for k in range(9):
        dy = (k // 3 - 1) * DIL
        dx = (k % 3 - 1) * DIL
        delta = dy * W + dx
        if delta == 0:
            taps.append(h)                       # center tap: mask is all-ones
            continue
        rolled = pltpu.roll(h, shift=(-delta) % N, axis=1)   # tap[p] = h[p+delta]
        taps.append(rolled * mask_ref[k:k + 1, :])
    col = jnp.concatenate(taps, axis=0)          # (9*Cr, N) im2col
    out = jnp.dot(w_ref[...], col, preferred_element_type=jnp.float32) + b_ref[...]
    return jnp.maximum(out, 0.0)


def spatial_gate_kernel(mask_ref, x_ref, w1_ref, b1_ref, w2_ref, b2_ref,
                        w3_ref, b3_ref, w4_ref, b4_ref, o_ref, *, W):
    x = x_ref[0]                                 # (C, N), compute dtype
    cdt = x.dtype

    # conv1 (1x1, BN folded) + ReLU; MXU matmul with f32 accumulation
    h = jnp.dot(w1_ref[...], x, preferred_element_type=jnp.float32) + b1_ref[...]
    h = jnp.maximum(h, 0.0).astype(cdt)          # (Cr, N)

    # two dilated 3x3 convs (BN folded) + ReLU
    h = _dilated_conv3x3_relu(h, w2_ref, b2_ref, mask_ref, W).astype(cdt)
    h = _dilated_conv3x3_relu(h, w3_ref, b3_ref, mask_ref, W).astype(cdt)

    # conv4 (1x1 -> 1 gate channel): lane-dense (1,Cr)@(Cr,N) MXU dot
    g = jnp.dot(w4_ref[...], h, preferred_element_type=jnp.float32) + b4_ref[...]
    o_ref[0] = g                                 # (1, N) lane-dense store


# ------------------------------- wrapper ----------------------------------- #

def _mxu_compute_dtype():
    """bf16 MXU operands on v6e/v7x+; f32 on v5e and older (no bf16 VPU)."""
    try:
        kind = jax.devices()[0].device_kind.lower()
    except Exception:
        return jnp.float32
    if "tpu" not in kind:
        return jnp.float32
    for old in ("v2", "v3", "v4", "v5"):
        if old in kind:
            return jnp.float32
    return jnp.bfloat16


def _make_tap_masks(H, W, NB, Npad, dtype):
    """(9, Npad) border-validity masks using per-image coords (repeat per image)."""
    HW = H * W
    q = jnp.arange(HW, dtype=jnp.int32)
    hh = q // W
    ww = q % W
    rows = []
    for k in range(9):
        dy = (k // 3 - 1) * DIL
        dx = (k % 3 - 1) * DIL
        rows.append((hh + dy >= 0) & (hh + dy < H) & (ww + dx >= 0) & (ww + dx < W))
    m = jnp.stack(rows, axis=0)                  # (9, HW) bool
    m = jnp.tile(m, (1, NB)).astype(dtype)       # (9, NB*HW) — per-image pattern
    if Npad != NB * HW:
        m = jnp.pad(m, ((0, 0), (0, Npad - NB * HW)))   # padded lanes masked out
    return m


def _pick_group_size(B, HW, C, Cr, itemsize, budget_bytes=16 << 20):
    """Largest divisor of B such that the packed working set stays small."""
    per_lane = (2 * C + 24 * Cr + 32) * itemsize + 8
    budget_lanes = max(HW, budget_bytes // per_lane)
    nb = 1
    for cand in range(1, B + 1):
        if B % cand == 0 and cand * HW <= budget_lanes:
            nb = cand
    return nb


def spatial_gate(x_nchw, params):
    B, C, H, W = x_nchw.shape
    HW = H * W
    w1, b1, w2, b2, w3, b3, w4, b4 = params
    Cr = w1.shape[0]

    compute_dtype = _mxu_compute_dtype()
    itemsize = jnp.dtype(compute_dtype).itemsize

    # ---- batch-lane packing: (B, C, H, W) -> (G, C, NB*HW) ----
    NB = _pick_group_size(B, HW, C, Cr, itemsize)
    G = B // NB
    N = NB * HW
    xg = (x_nchw.astype(compute_dtype)
          .reshape(G, NB, C, HW)
          .transpose(0, 2, 1, 3)                 # (G, C, NB, HW)
          .reshape(G, C, N))

    # keep the lane axis a multiple of 128 so output stores are unmasked vst
    Npad = ((N + 127) // 128) * 128
    if Npad != N:
        xg = jnp.pad(xg, ((0, 0), (0, 0), (0, Npad - N)))

    masks = _make_tap_masks(H, W, NB, Npad, compute_dtype)       # (9, Npad)

    # matmul operands in the MXU compute dtype; biases / accumulation stay f32
    w1c, w2c, w3c, w4c = (w.astype(compute_dtype) for w in (w1, w2, w3, w4))

    # VMEM sizing: double-buffered x/mask/output blocks + conv temporaries,
    # capped at ~3/4 of physical VMEM (48 MiB on v7x, 96 MiB on v5e/v6e).
    est = Npad * (2 * C * itemsize + 18 * itemsize + 8
                  + 8 * Cr + 22 * Cr * itemsize) + (2 << 20)
    try:
        vmem_cap = int(pltpu.get_tpu_info().vmem_capacity_bytes)
    except Exception:
        vmem_cap = 64 << 20
    vmem_bytes = int(min(max(4 << 20, est), max(4 << 20, (3 * vmem_cap) // 4)))

    # TODO(synk): for production BAM shapes (e.g. C=512, 128x128 maps) add
    # spatial tiling grid=(G, H//tH) with a DIL-row halo so the block fits
    # v7x's 64 MiB VMEM, and keep the parallel extent a multiple of 2 TCs.

    kernel = functools.partial(spatial_gate_kernel, W=W)
    gate = pl.pallas_call(
        kernel,
        out_shape=jax.ShapeDtypeStruct((G, 1, Npad), jnp.float32),
        grid_spec=pltpu.PrefetchScalarGridSpec(
            num_scalar_prefetch=0,
            grid=(G,),
            in_specs=[
                pl.BlockSpec((9, Npad), lambda g: (0, 0)),        # tap masks (resident)
                pl.BlockSpec((1, C, Npad), lambda g: (g, 0, 0)),  # packed input group
                pl.BlockSpec((Cr, C), lambda g: (0, 0)),          # conv1 weights
                pl.BlockSpec((Cr, 1), lambda g: (0, 0)),
                pl.BlockSpec((Cr, 9 * Cr), lambda g: (0, 0)),     # dilated conv 1
                pl.BlockSpec((Cr, 1), lambda g: (0, 0)),
                pl.BlockSpec((Cr, 9 * Cr), lambda g: (0, 0)),     # dilated conv 2
                pl.BlockSpec((Cr, 1), lambda g: (0, 0)),
                pl.BlockSpec((1, Cr), lambda g: (0, 0)),          # conv4 weights
                pl.BlockSpec((1, 1), lambda g: (0, 0)),
            ],
            out_specs=pl.BlockSpec((1, 1, Npad), lambda g: (g, 0, 0)),
        ),
        compiler_params=pltpu.CompilerParams(
            dimension_semantics=("parallel",),
            vmem_limit_bytes=vmem_bytes),
    )(masks, xg, w1c, b1, w2c, b2, w3c, b3, w4c, b4)

    # drop lane padding, unpack batch, broadcast the gate over all C (expand_as)
    gate = gate[:, :, :N].reshape(B, 1, H, W)
    return jnp.broadcast_to(gate, (B, C, H, W))


# ------------------------ deterministic parameters ------------------------- #

def _make_conv_bn(key, cin, cout, ksize, eps=1e-5):
    k = jax.random.split(key, 6)
    fan_in = cin * ksize * ksize
    bound = 1.0 / (fan_in ** 0.5)
    w = jax.random.uniform(k[0], (cout, cin, ksize, ksize), jnp.float32, -bound, bound)
    b = jax.random.uniform(k[1], (cout,), jnp.float32, -bound, bound)
    gamma = jax.random.uniform(k[2], (cout,), jnp.float32, 0.5, 1.5)
    beta = jax.random.uniform(k[3], (cout,), jnp.float32, -0.2, 0.2)
    mean = 0.1 * jax.random.normal(k[4], (cout,), jnp.float32)
    var = jax.random.uniform(k[5], (cout,), jnp.float32, 0.5, 1.5)
    # fold BN (eval mode) into the conv
    s = gamma / jnp.sqrt(var + eps)
    w_f = w * s[:, None, None, None]
    b_f = s * (b - mean) + beta
    return w_f, b_f


def _make_conv(key, cin, cout, ksize):
    k = jax.random.split(key, 2)
    fan_in = cin * ksize * ksize
    bound = 1.0 / (fan_in ** 0.5)
    w = jax.random.uniform(k[0], (cout, cin, ksize, ksize), jnp.float32, -bound, bound)
    b = jax.random.uniform(k[1], (cout,), jnp.float32, -bound, bound)
    return w, b


def init_spatial_gate_params(key, gate_channel, reduction_ratio=4):
    C = gate_channel
    Cr = gate_channel // reduction_ratio
    k = jax.random.split(key, 4)
    w1, b1 = _make_conv_bn(k[0], C, Cr, 1)    # 1x1 conv + BN
    w2, b2 = _make_conv_bn(k[1], Cr, Cr, 3)   # dilated 3x3 + BN
    w3, b3 = _make_conv_bn(k[2], Cr, Cr, 3)   # dilated 3x3 + BN
    w4, b4 = _make_conv(k[3], Cr, 1, 1)       # 1x1 conv -> 1 channel
    # kernel-friendly forms for the (C, N) pixels-on-lane layout
    w1m = w1[:, :, 0, 0]                                            # (Cr, C)
    w2m = jnp.transpose(w2, (0, 2, 3, 1)).reshape(Cr, 9 * Cr)       # (Cr, 9*Cr), tap-major
    w3m = jnp.transpose(w3, (0, 2, 3, 1)).reshape(Cr, 9 * Cr)
    w4m = w4[:, :, 0, 0]                                            # (1, Cr)
    return (w1m, b1.reshape(Cr, 1), w2m, b2.reshape(Cr, 1),
            w3m, b3.reshape(Cr, 1), w4m, b4.reshape(1, 1))


# ------------------------------ reference ---------------------------------- #

def spatial_gate_reference(x_nchw, params):
    w1, b1, w2, b2, w3, b3, w4, b4 = params
    B, C, H, W = x_nchw.shape
    Cr = w1.shape[0]
    x = jnp.transpose(x_nchw, (0, 2, 3, 1)).astype(jnp.float32)   # NHWC
    h = jnp.maximum(jnp.einsum('bhwc,oc->bhwo', x, w1) + b1[:, 0], 0.0)

    def dil(h, wk, bb):
        w_hwio = jnp.transpose(wk.reshape(Cr, 3, 3, Cr), (1, 2, 3, 0))
        out = jax.lax.conv_general_dilated(
            h, w_hwio, window_strides=(1, 1), padding=((DIL, DIL), (DIL, DIL)),
            rhs_dilation=(DIL, DIL), dimension_numbers=('NHWC', 'HWIO', 'NHWC'))
        return jnp.maximum(out + bb[:, 0], 0.0)

    h = dil(h, w2, b2)
    h = dil(h, w3, b3)
    g = jnp.einsum('bhwr,or->bhwo', h, w4)[..., 0] + b4[0, 0]
    return jnp.broadcast_to(g[:, None, :, :], (B, C, H, W))


# --------------------------------- main ------------------------------------ #

if __name__ == "__main__":
    key = jax.random.PRNGKey(0)
    kx, kp = jax.random.split(key)
    B, C, H, W = 2, 8, 16, 16          # gate_channel=8, reduction_ratio=4 -> Cr=2
    x = jax.random.normal(kx, (B, C, H, W), jnp.float32)
    params = init_spatial_gate_params(kp, gate_channel=C, reduction_ratio=4)

    out = jax.block_until_ready(spatial_gate(x, params))
    ref = spatial_gate_reference(x, params)

    tol = 2e-2 if _mxu_compute_dtype() == jnp.bfloat16 else 2e-3
    assert out.shape == (B, C, H, W), out.shape
    assert jnp.allclose(out, ref, atol=tol, rtol=tol), \
        float(jnp.max(jnp.abs(out - ref)))
    print("KERNEL_OK")
</pallas_src>

<mosaic_0001>
module attributes {stable_mosaic.version = 11 : i64} {
  func.func @spatial_gate_kernel(%arg0: i32, %arg1: memref<9x512xf32, #tpu.memory_space<vmem>>, %arg2: memref<1x8x512xf32, #tpu.memory_space<vmem>>, %arg3: memref<2x8xf32, #tpu.memory_space<vmem>>, %arg4: memref<2x1xf32, #tpu.memory_space<vmem>>, %arg5: memref<2x18xf32, #tpu.memory_space<vmem>>, %arg6: memref<2x1xf32, #tpu.memory_space<vmem>>, %arg7: memref<2x18xf32, #tpu.memory_space<vmem>>, %arg8: memref<2x1xf32, #tpu.memory_space<vmem>>, %arg9: memref<1x2xf32, #tpu.memory_space<vmem>>, %arg10: memref<1x1xf32, #tpu.memory_space<vmem>>, %arg11: memref<1x1x512xf32, #tpu.memory_space<vmem>>) attributes {dimension_semantics = [#tpu.dimension_semantics<parallel>], iteration_bounds = array<i64: 1>, scalar_prefetch = 0 : i64, scratch_operands = 0 : i64, tpu.core_type = #tpu.core_type<tc>, window_params = [{pipeline_mode = #tpu.pipeline_mode<synchronous>, transform_indices = @transform_0, window_bounds = array<i64: 9, 512>}, {transform_indices = @transform_1, window_bounds = array<i64: 1, 8, 512>}, {pipeline_mode = #tpu.pipeline_mode<synchronous>, transform_indices = @transform_2, window_bounds = array<i64: 2, 8>}, {pipeline_mode = #tpu.pipeline_mode<synchronous>, transform_indices = @transform_3, window_bounds = array<i64: 2, 1>}, {pipeline_mode = #tpu.pipeline_mode<synchronous>, transform_indices = @transform_4, window_bounds = array<i64: 2, 18>}, {pipeline_mode = #tpu.pipeline_mode<synchronous>, transform_indices = @transform_5, window_bounds = array<i64: 2, 1>}, {pipeline_mode = #tpu.pipeline_mode<synchronous>, transform_indices = @transform_6, window_bounds = array<i64: 2, 18>}, {pipeline_mode = #tpu.pipeline_mode<synchronous>, transform_indices = @transform_7, window_bounds = array<i64: 2, 1>}, {pipeline_mode = #tpu.pipeline_mode<synchronous>, transform_indices = @transform_8, window_bounds = array<i64: 1, 2>}, {pipeline_mode = #tpu.pipeline_mode<synchronous>, transform_indices = @transform_9, window_bounds = array<i64: 1, 1>}, {transform_indices = @transform_10, window_bounds = array<i64: 1, 1, 512>}]} {
    %c0 = arith.constant 0 : index
    %c0_0 = arith.constant 0 : index
    %c0_1 = arith.constant 0 : index
    %0 = vector.load %arg2[%c0, %c0_0, %c0_1] : memref<1x8x512xf32, #tpu.memory_space<vmem>>, vector<1x8x512xf32>
    %1 = vector.shape_cast %0 : vector<1x8x512xf32> to vector<8x512xf32>
    %c0_2 = arith.constant 0 : index
    %c0_3 = arith.constant 0 : index
    %2 = vector.load %arg3[%c0_2, %c0_3] : memref<2x8xf32, #tpu.memory_space<vmem>>, vector<2x8xf32>
    %cst = arith.constant dense<0.000000e+00> : vector<2x512xf32>
    %3 = tpu.matmul %2, %1, %cst {dimension_numbers = #tpu.dot_dimension_numbers<[1], [0], [0], [1], [0, 0, 1, 1], [], []>} : vector<2x8xf32>, vector<8x512xf32>, vector<2x512xf32> -> vector<2x512xf32>
    %c0_4 = arith.constant 0 : index
    %c0_5 = arith.constant 0 : index
    %4 = vector.load %arg4[%c0_4, %c0_5] : memref<2x1xf32, #tpu.memory_space<vmem>>, vector<2x1xf32>
    %5 = vector.broadcast %4 : vector<2x1xf32> to vector<2x512xf32>
    %6 = arith.addf %3, %5 : vector<2x512xf32>
    %cst_6 = arith.constant 0.000000e+00 : f32
    %7 = vector.broadcast %cst_6 : f32 to vector<2x512xf32>
    %8 = arith.maximumf %6, %7 : vector<2x512xf32>
    %c68_i32 = arith.constant 68 : i32
    %9 = tpu.dynamic_rotate %8 by %c68_i32 dim 1 : vector<2x512xf32>, i32 -> vector<2x512xf32>
    %c0_7 = arith.constant 0 : index
    %c0_8 = arith.constant 0 : index
    %10 = vector.load %arg1[%c0_7, %c0_8] : memref<9x512xf32, #tpu.memory_space<vmem>>, vector<1x512xf32>
    %11 = vector.broadcast %10 : vector<1x512xf32> to vector<2x512xf32>
    %12 = arith.mulf %9, %11 : vector<2x512xf32>
    %c64_i32 = arith.constant 64 : i32
    %13 = tpu.dynamic_rotate %8 by %c64_i32 dim 1 : vector<2x512xf32>, i32 -> vector<2x512xf32>
    %c1 = arith.constant 1 : index
    %c0_9 = arith.constant 0 : index
    %14 = vector.load %arg1[%c1, %c0_9] : memref<9x512xf32, #tpu.memory_space<vmem>>, vector<1x512xf32>
    %15 = vector.broadcast %14 : vector<1x512xf32> to vector<2x512xf32>
    %16 = arith.mulf %13, %15 : vector<2x512xf32>
    %c60_i32 = arith.constant 60 : i32
    %17 = tpu.dynamic_rotate %8 by %c60_i32 dim 1 : vector<2x512xf32>, i32 -> vector<2x512xf32>
    %c2 = arith.constant 2 : index
    %c0_10 = arith.constant 0 : index
    %18 = vector.load %arg1[%c2, %c0_10] : memref<9x512xf32, #tpu.memory_space<vmem>>, vector<1x512xf32>
    %19 = vector.broadcast %18 : vector<1x512xf32> to vector<2x512xf32>
    %20 = arith.mulf %17, %19 : vector<2x512xf32>
    %c4_i32 = arith.constant 4 : i32
    %21 = tpu.dynamic_rotate %8 by %c4_i32 dim 1 : vector<2x512xf32>, i32 -> vector<2x512xf32>
    %c3 = arith.constant 3 : index
    %c0_11 = arith.constant 0 : index
    %22 = vector.load %arg1[%c3, %c0_11] : memref<9x512xf32, #tpu.memory_space<vmem>>, vector<1x512xf32>
    %23 = vector.broadcast %22 : vector<1x512xf32> to vector<2x512xf32>
    %24 = arith.mulf %21, %23 : vector<2x512xf32>
    %c508_i32 = arith.constant 508 : i32
    %25 = tpu.dynamic_rotate %8 by %c508_i32 dim 1 : vector<2x512xf32>, i32 -> vector<2x512xf32>
    %c5 = arith.constant 5 : index
    %c0_12 = arith.constant 0 : index
    %26 = vector.load %arg1[%c5, %c0_12] : memref<9x512xf32, #tpu.memory_space<vmem>>, vector<1x512xf32>
    %27 = vector.broadcast %26 : vector<1x512xf32> to vector<2x512xf32>
    %28 = arith.mulf %25, %27 : vector<2x512xf32>
    %c452_i32 = arith.constant 452 : i32
    %29 = tpu.dynamic_rotate %8 by %c452_i32 dim 1 : vector<2x512xf32>, i32 -> vector<2x512xf32>
    %c6 = arith.constant 6 : index
    %c0_13 = arith.constant 0 : index
    %30 = vector.load %arg1[%c6, %c0_13] : memref<9x512xf32, #tpu.memory_space<vmem>>, vector<1x512xf32>
    %31 = vector.broadcast %30 : vector<1x512xf32> to vector<2x512xf32>
    %32 = arith.mulf %29, %31 : vector<2x512xf32>
    %c448_i32 = arith.constant 448 : i32
    %33 = tpu.dynamic_rotate %8 by %c448_i32 dim 1 : vector<2x512xf32>, i32 -> vector<2x512xf32>
    %c7 = arith.constant 7 : index
    %c0_14 = arith.constant 0 : index
    %34 = vector.load %arg1[%c7, %c0_14] : memref<9x512xf32, #tpu.memory_space<vmem>>, vector<1x512xf32>
    %35 = vector.broadcast %34 : vector<1x512xf32> to vector<2x512xf32>
    %36 = arith.mulf %33, %35 : vector<2x512xf32>
    %c444_i32 = arith.constant 444 : i32
    %37 = tpu.dynamic_rotate %8 by %c444_i32 dim 1 : vector<2x512xf32>, i32 -> vector<2x512xf32>
    %c8 = arith.constant 8 : index
    %c0_15 = arith.constant 0 : index
    %38 = vector.load %arg1[%c8, %c0_15] : memref<9x512xf32, #tpu.memory_space<vmem>>, vector<1x512xf32>
    %39 = vector.broadcast %38 : vector<1x512xf32> to vector<2x512xf32>
    %40 = arith.mulf %37, %39 : vector<2x512xf32>
    %41 = tpu.concatenate %12, %16, %20, %24, %8, %28, %32, %36, %40 in 0 : vector<2x512xf32>, vector<2x512xf32>, vector<2x512xf32>, vector<2x512xf32>, vector<2x512xf32>, vector<2x512xf32>, vector<2x512xf32>, vector<2x512xf32>, vector<2x512xf32> -> vector<18x512xf32>
    %c0_16 = arith.constant 0 : index
    %c0_17 = arith.constant 0 : index
    %42 = vector.load %arg5[%c0_16, %c0_17] : memref<2x18xf32, #tpu.memory_space<vmem>>, vector<2x18xf32>
    %cst_18 = arith.constant dense<0.000000e+00> : vector<2x512xf32>
    %43 = tpu.matmul %42, %41, %cst_18 {dimension_numbers = #tpu.dot_dimension_numbers<[1], [0], [0], [1], [0, 0, 1, 1], [], []>} : vector<2x18xf32>, vector<18x512xf32>, vector<2x512xf32> -> vector<2x512xf32>
    %c0_19 = arith.constant 0 : index
    %c0_20 = arith.constant 0 : index
    %44 = vector.load %arg6[%c0_19, %c0_20] : memref<2x1xf32, #tpu.memory_space<vmem>>, vector<2x1xf32>
    %45 = vector.broadcast %44 : vector<2x1xf32> to vector<2x512xf32>
    %46 = arith.addf %43, %45 : vector<2x512xf32>
    %cst_21 = arith.constant 0.000000e+00 : f32
    %47 = vector.broadcast %cst_21 : f32 to vector<2x512xf32>
    %48 = arith.maximumf %46, %47 : vector<2x512xf32>
    %c68_i32_22 = arith.constant 68 : i32
    %49 = tpu.dynamic_rotate %48 by %c68_i32_22 dim 1 : vector<2x512xf32>, i32 -> vector<2x512xf32>
    %c0_23 = arith.constant 0 : index
    %c0_24 = arith.constant 0 : index
    %50 = vector.load %arg1[%c0_23, %c0_24] : memref<9x512xf32, #tpu.memory_space<vmem>>, vector<1x512xf32>
    %51 = vector.broadcast %50 : vector<1x512xf32> to vector<2x512xf32>
    %52 = arith.mulf %49, %51 : vector<2x512xf32>
    %c64_i32_25 = arith.constant 64 : i32
    %53 = tpu.dynamic_rotate %48 by %c64_i32_25 dim 1 : vector<2x512xf32>, i32 -> vector<2x512xf32>
    %c1_26 = arith.constant 1 : index
    %c0_27 = arith.constant 0 : index
    %54 = vector.load %arg1[%c1_26, %c0_27] : memref<9x512xf32, #tpu.memory_space<vmem>>, vector<1x512xf32>
    %55 = vector.broadcast %54 : vector<1x512xf32> to vector<2x512xf32>
    %56 = arith.mulf %53, %55 : vector<2x512xf32>
    %c60_i32_28 = arith.constant 60 : i32
    %57 = tpu.dynamic_rotate %48 by %c60_i32_28 dim 1 : vector<2x512xf32>, i32 -> vector<2x512xf32>
    %c2_29 = arith.constant 2 : index
    %c0_30 = arith.constant 0 : index
    %58 = vector.load %arg1[%c2_29, %c0_30] : memref<9x512xf32, #tpu.memory_space<vmem>>, vector<1x512xf32>
    %59 = vector.broadcast %58 : vector<1x512xf32> to vector<2x512xf32>
    %60 = arith.mulf %57, %59 : vector<2x512xf32>
    %c4_i32_31 = arith.constant 4 : i32
    %61 = tpu.dynamic_rotate %48 by %c4_i32_31 dim 1 : vector<2x512xf32>, i32 -> vector<2x512xf32>
    %c3_32 = arith.constant 3 : index
    %c0_33 = arith.constant 0 : index
    %62 = vector.load %arg1[%c3_32, %c0_33] : memref<9x512xf32, #tpu.memory_space<vmem>>, vector<1x512xf32>
    %63 = vector.broadcast %62 : vector<1x512xf32> to vector<2x512xf32>
    %64 = arith.mulf %61, %63 : vector<2x512xf32>
    %c508_i32_34 = arith.constant 508 : i32
    %65 = tpu.dynamic_rotate %48 by %c508_i32_34 dim 1 : vector<2x512xf32>, i32 -> vector<2x512xf32>
    %c5_35 = arith.constant 5 : index
    %c0_36 = arith.constant 0 : index
    %66 = vector.load %arg1[%c5_35, %c0_36] : memref<9x512xf32, #tpu.memory_space<vmem>>, vector<1x512xf32>
    %67 = vector.broadcast %66 : vector<1x512xf32> to vector<2x512xf32>
    %68 = arith.mulf %65, %67 : vector<2x512xf32>
    %c452_i32_37 = arith.constant 452 : i32
    %69 = tpu.dynamic_rotate %48 by %c452_i32_37 dim 1 : vector<2x512xf32>, i32 -> vector<2x512xf32>
    %c6_38 = arith.constant 6 : index
    %c0_39 = arith.constant 0 : index
    %70 = vector.load %arg1[%c6_38, %c0_39] : memref<9x512xf32, #tpu.memory_space<vmem>>, vector<1x512xf32>
    %71 = vector.broadcast %70 : vector<1x512xf32> to vector<2x512xf32>
    %72 = arith.mulf %69, %71 : vector<2x512xf32>
    %c448_i32_40 = arith.constant 448 : i32
    %73 = tpu.dynamic_rotate %48 by %c448_i32_40 dim 1 : vector<2x512xf32>, i32 -> vector<2x512xf32>
    %c7_41 = arith.constant 7 : index
    %c0_42 = arith.constant 0 : index
    %74 = vector.load %arg1[%c7_41, %c0_42] : memref<9x512xf32, #tpu.memory_space<vmem>>, vector<1x512xf32>
    %75 = vector.broadcast %74 : vector<1x512xf32> to vector<2x512xf32>
    %76 = arith.mulf %73, %75 : vector<2x512xf32>
    %c444_i32_43 = arith.constant 444 : i32
    %77 = tpu.dynamic_rotate %48 by %c444_i32_43 dim 1 : vector<2x512xf32>, i32 -> vector<2x512xf32>
    %c8_44 = arith.constant 8 : index
    %c0_45 = arith.constant 0 : index
    %78 = vector.load %arg1[%c8_44, %c0_45] : memref<9x512xf32, #tpu.memory_space<vmem>>, vector<1x512xf32>
    %79 = vector.broadcast %78 : vector<1x512xf32> to vector<2x512xf32>
    %80 = arith.mulf %77, %79 : vector<2x512xf32>
    %81 = tpu.concatenate %52, %56, %60, %64, %48, %68, %72, %76, %80 in 0 : vector<2x512xf32>, vector<2x512xf32>, vector<2x512xf32>, vector<2x512xf32>, vector<2x512xf32>, vector<2x512xf32>, vector<2x512xf32>, vector<2x512xf32>, vector<2x512xf32> -> vector<18x512xf32>
    %c0_46 = arith.constant 0 : index
    %c0_47 = arith.constant 0 : index
    %82 = vector.load %arg7[%c0_46, %c0_47] : memref<2x18xf32, #tpu.memory_space<vmem>>, vector<2x18xf32>
    %cst_48 = arith.constant dense<0.000000e+00> : vector<2x512xf32>
    %83 = tpu.matmul %82, %81, %cst_48 {dimension_numbers = #tpu.dot_dimension_numbers<[1], [0], [0], [1], [0, 0, 1, 1], [], []>} : vector<2x18xf32>, vector<18x512xf32>, vector<2x512xf32> -> vector<2x512xf32>
    %c0_49 = arith.constant 0 : index
    %c0_50 = arith.constant 0 : index
    %84 = vector.load %arg8[%c0_49, %c0_50] : memref<2x1xf32, #tpu.memory_space<vmem>>, vector<2x1xf32>
    %85 = vector.broadcast %84 : vector<2x1xf32> to vector<2x512xf32>
    %86 = arith.addf %83, %85 : vector<2x512xf32>
    %cst_51 = arith.constant 0.000000e+00 : f32
    %87 = vector.broadcast %cst_51 : f32 to vector<2x512xf32>
    %88 = arith.maximumf %86, %87 : vector<2x512xf32>
    %c0_52 = arith.constant 0 : index
    %c0_53 = arith.constant 0 : index
    %89 = vector.load %arg9[%c0_52, %c0_53] : memref<1x2xf32, #tpu.memory_space<vmem>>, vector<1x2xf32>
    %cst_54 = arith.constant dense<0.000000e+00> : vector<1x512xf32>
    %90 = tpu.matmul %89, %88, %cst_54 {dimension_numbers = #tpu.dot_dimension_numbers<[1], [0], [0], [1], [0, 0, 1, 1], [], []>} : vector<1x2xf32>, vector<2x512xf32>, vector<1x512xf32> -> vector<1x512xf32>
    %c0_55 = arith.constant 0 : index
    %c0_56 = arith.constant 0 : index
    %91 = vector.load %arg10[%c0_55, %c0_56] : memref<1x1xf32, #tpu.memory_space<vmem>>, vector<1x1xf32>
    %92 = vector.broadcast %91 : vector<1x1xf32> to vector<1x512xf32>
    %93 = arith.addf %90, %92 : vector<1x512xf32>
    %c0_57 = arith.constant 0 : index
    %c0_58 = arith.constant 0 : index
    %c0_59 = arith.constant 0 : index
    %94 = vector.load %arg11[%c0_57, %c0_58, %c0_59] : memref<1x1x512xf32, #tpu.memory_space<vmem>>, vector<1x1x512xf32>
    %95 = vector.shape_cast %94 : vector<1x1x512xf32> to vector<1x512xf32>
    %96 = vector.shape_cast %93 : vector<1x512xf32> to vector<1x1x512xf32>
    tpu.vector_store %arg11[%c0_57, %c0_58, %c0_59], %96 {strides = array<i32>} : memref<1x1x512xf32, #tpu.memory_space<vmem>>, vector<1x1x512xf32>,
    return
  }
  func.func @transform_0(%arg0: i32) -> (i32, i32) {
    %c0_i32 = arith.constant 0 : i32
    %c0_i32_0 = arith.constant 0 : i32
    %c0_i32_1 = arith.constant 0 : i32
    return %c0_i32, %c0_i32_0 : i32, i32
  }
  func.func @transform_1(%arg0: i32) -> (i32, i32, i32) {
    %c0_i32 = arith.constant 0 : i32
    %c0_i32_0 = arith.constant 0 : i32
    %c0_i32_1 = arith.constant 0 : i32
    return %arg0, %c0_i32, %c0_i32_0 : i32, i32, i32
  }
  func.func @transform_2(%arg0: i32) -> (i32, i32) {
    %c0_i32 = arith.constant 0 : i32
    %c0_i32_0 = arith.constant 0 : i32
    %c0_i32_1 = arith.constant 0 : i32
    return %c0_i32, %c0_i32_0 : i32, i32
  }
  func.func @transform_3(%arg0: i32) -> (i32, i32) {
    %c0_i32 = arith.constant 0 : i32
    %c0_i32_0 = arith.constant 0 : i32
    %c0_i32_1 = arith.constant 0 : i32
    return %c0_i32, %c0_i32_0 : i32, i32
  }
  func.func @transform_4(%arg0: i32) -> (i32, i32) {
    %c0_i32 = arith.constant 0 : i32
    %c0_i32_0 = arith.constant 0 : i32
    %c0_i32_1 = arith.constant 0 : i32
    return %c0_i32, %c0_i32_0 : i32, i32
  }
  func.func @transform_5(%arg0: i32) -> (i32, i32) {
    %c0_i32 = arith.constant 0 : i32
    %c0_i32_0 = arith.constant 0 : i32
    %c0_i32_1 = arith.constant 0 : i32
    return %c0_i32, %c0_i32_0 : i32, i32
  }
  func.func @transform_6(%arg0: i32) -> (i32, i32) {
    %c0_i32 = arith.constant 0 : i32
    %c0_i32_0 = arith.constant 0 : i32
    %c0_i32_1 = arith.constant 0 : i32
    return %c0_i32, %c0_i32_0 : i32, i32
  }
  func.func @transform_7(%arg0: i32) -> (i32, i32) {
    %c0_i32 = arith.constant 0 : i32
    %c0_i32_0 = arith.constant 0 : i32
    %c0_i32_1 = arith.constant 0 : i32
    return %c0_i32, %c0_i32_0 : i32, i32
  }
  func.func @transform_8(%arg0: i32) -> (i32, i32) {
    %c0_i32 = arith.constant 0 : i32
    %c0_i32_0 = arith.constant 0 : i32
    %c0_i32_1 = arith.constant 0 : i32
    return %c0_i32, %c0_i32_0 : i32, i32
  }
  func.func @transform_9(%arg0: i32) -> (i32, i32) {
    %c0_i32 = arith.constant 0 : i32
    %c0_i32_0 = arith.constant 0 : i32
    %c0_i32_1 = arith.constant 0 : i32
    return %c0_i32, %c0_i32_0 : i32, i32
  }
  func.func @transform_10(%arg0: i32) -> (i32, i32, i32) {
    %c0_i32 = arith.constant 0 : i32
    %c0_i32_0 = arith.constant 0 : i32
    %c0_i32_1 = arith.constant 0 : i32
    return %arg0, %c0_i32, %c0_i32_0 : i32, i32, i32
  }
}

</mosaic_0001>

<bundles_post_ra>
// kernel: tpu_custom_call.1
= control target key start
LH: loop header
LB: loop body
LE: loop exit
PB: predicated region body
PF: predicated region fallthrough
CT: control target
= control target key end

     0   :  { %s2126_s0 = inlined_call_operand.hbm [shape: f32[9,512], index: 0, kind: input, shape index: {}]   ;;  %s2127_s1 = inlined_call_operand.hbm [shape: f32[1,8,512], index: 1, kind: input, shape index: {}]   ;;  %s2128_s2 = inlined_call_operand.vmem [shape: f32[2,8], index: 2, kind: input, shape index: {}]   ;;  %s2129_s3 = inlined_call_operand.vmem [shape: f32[2,1], index: 3, kind: input, shape index: {}]   ;;  %s2130_s4 = inlined_call_operand.vmem [shape: f32[2,18], index: 4, kind: input, shape index: {}]   ;;  %s2131_s5 = inlined_call_operand.vmem [shape: f32[2,1], index: 5, kind: input, shape index: {}]   ;;  %s2132_s6 = inlined_call_operand.vmem [shape: f32[2,18], index: 6, kind: input, shape index: {}]   ;;  %s2133_s7 = inlined_call_operand.vmem [shape: f32[2,1], index: 7, kind: input, shape index: {}]   ;;  %s2134_s8 = inlined_call_operand.vmem [shape: f32[1,2], index: 8, kind: input, shape index: {}]   ;;  %s2135_s9 = inlined_call_operand.<no memory space> [shape: f32[1,1], index: 9, kind: input, shape index: {}]   ;;  %s2136_s10 = inlined_call_operand.hbm [shape: f32[1,1,512], index: 10, kind: output, shape index: {}]  }
   0x1   :  { %v15_v0 = vstv %s2135_s9 }
   0x2   :  { %16 = vst [vmem:[#allocation2] sm:$0x1] %v15_v0 }
   0x3   :  { %17 = vsyncpa [#allocation4], 0 }
   0x4   :  { %18 = vsyncpa [#allocation7], 0 }
   0x5   :  { %19 = vsyncpa [#allocation5], 0  ;;  %s1473_s15 = smov [#allocation3]   ;;  %s1401_s19 = scalar_lea.hbm %s2126_s0, 1024 }
   0x6   :  { %s25_s16 = sshll.u32 %s1473_s15, 4  ;;  %p1402_p0 = scmp.ne.s32.totalorder %s2126_s0, %s1401_s19  ;;  %s26_s16 = int_to_ptr.vmem [resolvable:$true] %s25_s16 }
   0x7   :  { %p1405_p1 = scmp.lt.u32.totalorder %s1401_s19, %s2126_s0 }
   0x9   :  { %p1407_p2 = pnand %p1405_p1, %p1402_p0 }
   0xb   :  { %1410 = shalt.err (!%p1407_p2)
}
   0xc   :  { %s1411_s9 = scalar_lea.vmem %s26_s16, 1024  ;;  %p1416_p4 = scmp.lt.s32.totalorder %s26_s16, %s26_s16 }
   0xd   :  { %p1412_p3 = scmp.ne.s32.totalorder %s26_s16, %s1411_s9  ;;  %p1417_p5 = scmp.lt.s32.totalorder %s1411_s9, %s1411_s9 }
   0xf   :  { %p1418_p6 = por %p1417_p5, %p1416_p4 }
  0x11   :  { %p1419_p7 = pnand %p1418_p6, %p1412_p3 }
  0x13   :  { %1422 = shalt.err (!%p1419_p7)
}
  0x14   :  { %s1474_s24 = smov 512   ;;  %s1475_s25 = smov 32  }
  0x15   :  { %31 = dma.hbm_to_vmem [thread:$0]  %s2126_s0, 1024, %s26_s16, [#allocation4], %s1474_s24, %s1474_s24, %s1475_s25  }
  0x16   :  { %s1476_s28 = smov [#allocation6]   ;;  %s1423_s12 = scalar_lea.hbm %s2127_s1, 512 }
  0x17   :  { %s38_s29 = sshll.u32 %s1476_s28, 4  ;;  %p1424_p8 = scmp.ne.s32.totalorder %s2127_s1, %s1423_s12  ;;  %s39_s29 = int_to_ptr.vmem [resolvable:$true] %s38_s29 }
  0x18   :  { %p1427_p9 = scmp.lt.u32.totalorder %s1423_s12, %s2127_s1 }
  0x1a   :  { %p1429_p10 = pnand %p1427_p9, %p1424_p8 }
  0x1c   :  { %1432 = shalt.err (!%p1429_p10)
}
  0x1d   :  { %s1433_s18 = scalar_lea.vmem %s39_s29, 512  ;;  %p1438_p12 = scmp.lt.s32.totalorder %s39_s29, %s39_s29 }
  0x1e   :  { %p1434_p11 = scmp.ne.s32.totalorder %s39_s29, %s1433_s18  ;;  %p1439_p13 = scmp.lt.s32.totalorder %s1433_s18, %s1433_s18 }
  0x20   :  { %p1440_p0 = por %p1439_p13, %p1438_p12 }
  0x22   :  { %p1441_p1 = pnand %p1440_p0, %p1434_p11 }
  0x24   :  { %1444 = shalt.err (!%p1441_p1)
}
  0x25   :  { %41 = dma.hbm_to_vmem [thread:$0]  %s2127_s1, 512, %s39_s29, [#allocation7]  }
  0x26   :  { %1467 = dma.done.wait [#allocation4], 1024  }
  0x27   :  { %1468 = vsyncadd [#allocation4], 4294966272 }
  0x28   :  { %1469 = dma.done.wait [#allocation7], 512  }
  0x29   :  { %1470 = vsyncadd [#allocation7], 4294966784  ;;  %v2138_v1 = vmov 0.0   ;;  %v1478_v2 = vmov 0   ;;  %v65_v3 = vld [vmem:[#allocation6 + $0x8] sm:$0xff]  ;;  %v67_v4 = vld [vmem:[#allocation6 + $0x18] sm:$0xff]  ;;  %v2137_v25 = vlaneseq }
  0x2a   :  { %143 = vmatprep.mubr.f32.mxu0 %v2138_v1  ;;  %214 = vmatprep.mubr.f32.mxu1 %v2138_v1  ;;  %v64_v5 = vld [vmem:[#allocation6] sm:$0xff]  ;;  %vm75_vm0 = vcmask 64512   ;;  %v66_v6 = vld [vmem:[#allocation6 + $0x10] sm:$0xff]  ;;  %s1481_s22 = smov 68   ;;  %s1482_s23 = smov 60   ;;  %vm579_vm4 = vcmask 1041408  }
  0x2b   :  { %1399 = vset.pattern.permute.xlu0 %v1478_v2  ;;  %1400 = vset.pattern.permute.xlu1 %v1478_v2  ;;  %v68_v7 = vld [vmem:[%s2128_s2] sm:$0x3]  ;;  %s1479_s2 = smov 64   ;;  %s1483_s9 = smov 4   ;;  %v1634_v27 = vshrl.u32 %v2137_v25, 7  ;;  %v1637_v29 = vand.u32 127, %v2137_v25 }
  0x2c   :  { %79 = vmatprep.subr.mxu0 %v65_v3  ;;  %150 = vmatprep.subr.mxu1 %v67_v4  ;;  %v69_v8 = vld [vmem:[%s2129_s3] sm:$0x3]  ;;  %s1480_s3 = smov 124   ;;  %v280_v33 = vld [vmem:[#allocation3 + $0x1] ss:$8 sm:$0xf] }
  0x2d   :  { %80 = vmatpush1.msra.mxu0 %v64_v5  ;;  %151 = vmatpush1.msra.mxu1 %v66_v6  ;;  %v607_v22 = vld [vmem:[%s2131_s5] sm:$0x3]  ;;  %2152 = vst [vmem:[#allocation12_spill] sm:$0xff] %v1634_v27  ;;  %v1640_v30 = vsub.s32 0, %v1634_v27  ;;  %v1643_v31 = vsub.s32 2, %v1634_v27  ;;  %v1646_v32 = vsub.s32 3, %v1634_v27 }
  0x2e   :  { %1350 = vmatmul.mubr.msk.f32.vlgmr.msra.gmra.mrb[0].mxu0 %vm75_vm0, %v68_v7  ;;  %1351 = vmatmul.mubr.msk.f32.vlgmr.msra.gmra.mrb[0].mxu1 %vm75_vm0, %v68_v7  ;;  %v454_v36 = vld [vmem:[#allocation3 + $0x7] ss:$8 sm:$0xf]  ;;  %v1649_v37 = vsub.s32 1, %v1634_v27  ;;  %vm274_vm1 = vcmp.lt.s32.totalorder %v1637_v29, 64  ;;  %vm394_vm2 = vcmp.lt.s32.totalorder %v1637_v29, 124 }
  0x2f   :  { %72 = vperm.xlu0 %1399, %v69_v8   ;;  %693 = vmatprep.mubr.f32.mxu0 %v2138_v1  ;;  %v400_v38 = vld [vmem:[#allocation3 + $0x5] ss:$8 sm:$0xf]  ;;  %v240_v39 = vld [vmem:[#allocation3] ss:$8 sm:$0xf]  ;;  %v1653_v40 = vrot.slane %v280_v33, %v1640_v30  ;;  %v1656_v41 = vrot.slane %v280_v33, %v1646_v32  ;;  %v1659_v42 = vrot.slane %v454_v36, %v1643_v31 }
  0x30   :  { %764 = vmatprep.mubr.f32.mxu1 %v2138_v1  ;;  %v1662_v43 = vrot.slane %v454_v36, %v1646_v32  ;;  %v427_v46 = vld [vmem:[#allocation3 + $0x6] ss:$8 sm:$0xf]  ;;  %v1666_v47 = vrot.slane %v400_v38, %v1640_v30  ;;  %v1669_v48 = vrot.slane %v400_v38, %v1649_v37  ;;  %v1672_v49 = vrot.slane %v400_v38, %v1643_v31  ;;  %v320_v50 = vld [vmem:[#allocation3 + $0x2] ss:$8 sm:$0xf] }
  0x31   :  { %2153 = vst [vmem:[#allocation13_spill] sm:$0xff] %v1659_v42  ;;  %v1675_v51 = vrot.slane %v400_v38, %v1646_v32  ;;  %vm235_vm3 = vcmp.lt.s32.totalorder %v1637_v29, 68  ;;  %v1679_v52 = vrot.slane %v240_v39, %v1649_v37  ;;  %v1682_v53 = vrot.slane %v240_v39, %v1643_v31  ;;  %v1684_v54 = vld [vmem:[#allocation3 + $0x20] ss:$8 sm:$0xf] }
  0x32   :  { %v1687_v55 = vrot.slane %v427_v46, %v1640_v30  ;;  %v1690_v56 = vrot.slane %v427_v46, %v1649_v37  ;;  %v1693_v57 = vrot.slane %v240_v39, %v1640_v30  ;;  %v1696_v58 = vrot.slane %v240_v39, %v1646_v32  ;;  %v360_v39 = vld [vmem:[#allocation3 + $0x3] ss:$8 sm:$0xf] }
  0x33   :  { %2154 = vst [vmem:[#allocation14_spill] sm:$0xff] %v1675_v51  ;;  %v1701_v62 = vrot.slane %v427_v46, %v1643_v31  ;;  %v1704_v63 = vrot.slane %v427_v46, %v1646_v32  ;;  %v1707_v0 = vrot.slane %v320_v50, %v1649_v37  ;;  %vm314_vm5 = vcmp.lt.s32.totalorder %v1637_v29, 60 }
  0x34   :  { %2155 = vst [vmem:[#allocation15_spill] sm:$0xff] %v1687_v55  ;;  %2156 = vst [vmem:[#allocation16_spill] sm:$0xff] %v1690_v56  ;;  %v1713_v3 = vrot.slane %v320_v50, %v1643_v31  ;;  %v1717_v4 = vrot.slane %v1684_v54, %v1649_v37  ;;  %v1720_v5 = vrot.slane %v320_v50, %v1640_v30  ;;  %vm584_vm6 = vcmask 1043456  }
  0x35   :  { %2157 = vst [vmem:[#allocation17_spill] sm:$0xff] %v1693_v57  ;;  %2158 = vst [vmem:[#allocation18_spill] sm:$0xff] %v1696_v58  ;;  %v1727_v8 = vrot.slane %v320_v50, %v1646_v32  ;;  %v1757_v38 = vrot.slane %v454_v36, %v1649_v37  ;;  %vm354_vm7 = vcmp.lt.s32.totalorder %v1637_v29, 4  ;;  %v1777_v1 = vrot.slane %v360_v39, %v1649_v37 }
  0x36   :  { %2159 = vst [vmem:[#allocation19_spill] sm:$0xff] %v1701_v62  ;;  %2160 = vst [vmem:[#allocation20_spill] sm:$0xff] %v1704_v63  ;;  %vm589_vm8 = vcmask 1045504   ;;  %vm613_vm9 = vcmask 146432   ;;  %vm1142_vm10 = vcmask 15360  }
  0x37   :  { %2161 = vst [vmem:[#allocation21_spill] sm:$0xff] %v1713_v3  ;;  %2162 = vst [vmem:[#allocation22_spill] sm:$0xff] %v1720_v5 }
  0x38   :  { %2163 = vst [vmem:[#allocation23_spill] sm:$0xff] %v1727_v8 }
  0xae   :  { %v73_v9 = vpop.permute.xlu0 %72 }
 0x101   :  { %v145_v10 = vpop.f32.mrb[0].mxu0  ;;  %v216_v11 = vpop.f32.mrb[0].mxu1 }
 0x102   :  { %v146_v12 = vadd.f32 %v145_v10, %v73_v9  ;;  %v217_v13 = vadd.f32 %v216_v11, %v73_v9  ;;  %v147_v14 = vpop.f32.mrb[1].mxu0  ;;  %v218_v15 = vpop.f32.mrb[1].mxu1 }
 0x103   :  { %v219_v18 = vadd.f32 %v218_v15, %v73_v9  ;;  %v148_v19 = vadd.f32 %v147_v14, %v73_v9  ;;  %v1731_v9 = vrot.slane %v1684_v54, %v1646_v32 }
 0x104   :  { %v1578_v16 = vmax.f32 %v146_v12, 0.0  ;;  %v1580_v17 = vmax.f32 %v217_v13, 0.0  ;;  %v1741_v13 = vrot.slane %v280_v33, %v1649_v37 }
 0x105   :  { %v1586_v20 = vmax.f32 %v219_v18, 0.0  ;;  %v1592_v21 = vmax.f32 %v148_v19, 0.0 }
 0x106   :  { %270 = vrot.lane.b32.xlu1 %v1580_v17, %s1479_s2  ;;  %266 = vrot.lane.b32.xlu0 %v1578_v16, %s1479_s2 }
 0x10a   :  { %386 = vrot.lane.b32.xlu1 %v1578_v16, %s1480_s3  ;;  %272 = vrot.lane.b32.xlu0 %v1586_v20, %s1479_s2 }
 0x10e   :  { %390 = vrot.lane.b32.xlu1 %v1580_v17, %s1480_s3  ;;  %388 = vrot.lane.b32.xlu0 %v1592_v21, %s1480_s3 }
 0x112   :  { %225 = vrot.lane.b32.xlu1 %v1578_v16, %s1481_s22  ;;  %392 = vrot.lane.b32.xlu0 %v1586_v20, %s1480_s3 }
 0x116   :  { %229 = vrot.lane.b32.xlu1 %v1580_v17, %s1481_s22  ;;  %227 = vrot.lane.b32.xlu0 %v1592_v21, %s1481_s22 }
 0x11a   :  { %306 = vrot.lane.b32.xlu1 %v1578_v16, %s1482_s23  ;;  %231 = vrot.lane.b32.xlu0 %v1586_v20, %s1481_s22 }
 0x11e   :  { %310 = vrot.lane.b32.xlu1 %v1580_v17, %s1482_s23  ;;  %308 = vrot.lane.b32.xlu0 %v1592_v21, %s1482_s23 }
 0x122   :  { %346 = vrot.lane.b32.xlu1 %v1578_v16, %s1483_s9  ;;  %312 = vrot.lane.b32.xlu0 %v1586_v20, %s1482_s23 }
 0x126   :  { %268 = vrot.lane.b32.xlu1 %v1592_v21, %s1479_s2  ;;  %348 = vrot.lane.b32.xlu0 %v1592_v21, %s1483_s9 }
 0x12a   :  { %350 = vrot.lane.b32.xlu1 %v1580_v17, %s1483_s9  ;;  %352 = vrot.lane.b32.xlu0 %v1586_v20, %s1483_s9 }
 0x12e   :  { %610 = vperm.xlu1 %1400, %v607_v22   ;;  %v1747_v22 = vrot.slane %v280_v33, %v1643_v31 }
 0x178   :  { %v1629_v23 = vpop.permute.xlu1 %270  ;;  %v1631_v24 = vpop.permute.xlu0 %266 }
 0x17c   :  { %v387_v26 = vpop.permute.xlu1 %386  ;;  %v273_v28 = vpop.permute.xlu0 %272 }
 0x17d   :  { %v275_v10 = vsel %vm274_vm1, %v1629_v23, %v273_v28  ;;  %v278_v11 = vsel %vm274_vm1, %v273_v28, %v1631_v24 }
 0x17e   :  { %v1761_v46 = vmul.f32 %v1656_v41, %v275_v10  ;;  %v1764_v33 = vmul.f32 %v1659_v42, %v275_v10  ;;  %v1767_v50 = vmul.f32 %v1662_v43, %v278_v11 }
 0x180   :  { %v391_v34 = vpop.permute.xlu1 %390  ;;  %v389_v35 = vpop.permute.xlu0 %388 }
 0x181   :  { %v397_v59 = vsel %vm394_vm2, %v387_v26, %v389_v35  ;;  %v396_v2 = vsel %vm394_vm2, %v389_v35, %v391_v34 }
 0x182   :  { %v422_v12 = vmul.f32 %v1666_v47, %v397_v59  ;;  %v423_v14 = vmul.f32 %v1669_v48, %v396_v2 }
 0x184   :  { %v226_v44 = vpop.permute.xlu1 %225  ;;  %v393_v45 = vpop.permute.xlu0 %392  ;;  %v547_v59 = vrot.slane %v422_v12, 6 }
 0x185   :  { %v395_v6 = vsel %vm394_vm2, %v391_v34, %v393_v45  ;;  %v398_v7 = vsel %vm394_vm2, %v393_v45, %v387_v26  ;;  %v1750_v26 = vrot.slane %v454_v36, %v1640_v30  ;;  %v302_v45 = vmul.f32 %v1653_v40, %v278_v11 }
 0x186   :  { %v424_v28 = vmul.f32 %v1672_v49, %v395_v6  ;;  %v425_v34 = vmul.f32 %v1675_v51, %v398_v7  ;;  %v548_v6 = vrot.slane %v423_v14, 6  ;;  %v1780_v11 = vrot.slane %v360_v39, %v1643_v31 }
 0x188   :  { %v230_v60 = vpop.permute.xlu1 %229  ;;  %v228_v61 = vpop.permute.xlu0 %227  ;;  %v549_v12 = vrot.slane %v424_v28, 6  ;;  %v550_v27 = vrot.slane %v425_v34, 6  ;;  %v594_v28 = vsel %vm579_vm4, %v1578_v16, %v547_v59  ;;  %v595_v42 = vsel %vm579_vm4, %v1592_v21, %v548_v6 }
 0x189   :  { %v238_v15 = vsel %vm235_vm3, %v226_v44, %v228_v61  ;;  %v237_v35 = vsel %vm235_vm3, %v228_v61, %v230_v60 }
 0x18a   :  { %v449_v61 = vmul.f32 %v1687_v55, %v238_v15  ;;  %v450_v7 = vmul.f32 %v1690_v56, %v237_v35  ;;  %v1783_v55 = vrot.slane %v360_v39, %v1640_v30  ;;  %v596_v37 = vsel %vm579_vm4, %v1580_v17, %v549_v12 }
 0x18b   :  { %v597_v51 = vsel %vm579_vm4, %v1586_v20, %v550_v27  ;;  %v263_v59 = vmul.f32 %v1679_v52, %v238_v15  ;;  %v264_v17 = vmul.f32 %v1682_v53, %v237_v35 }
 0x18c   :  { %v307_v18 = vpop.permute.xlu1 %306  ;;  %v232_v19 = vpop.permute.xlu0 %231  ;;  %v559_v34 = vrot.slane %v449_v61, 4 }
 0x18d   :  { %v236_v36 = vsel %vm235_vm3, %v230_v60, %v232_v19  ;;  %v239_v2 = vsel %vm235_vm3, %v232_v19, %v226_v44  ;;  %v1786_v60 = vrot.slane %v360_v39, %v1646_v32  ;;  %v511_v44 = vrot.slane %v302_v45, 6 }
 0x18e   :  { %v451_v19 = vmul.f32 %v1701_v62, %v236_v36  ;;  %v452_v56 = vmul.f32 %v1704_v63, %v239_v2  ;;  %v560_v32 = vrot.slane %v450_v7, 4  ;;  %v262_v39 = vmul.f32 %v1693_v57, %v239_v2 }
 0x18f   :  { %v598_v20 = vsel %vm584_vm6, %v594_v28, %v559_v34  ;;  %v265_v27 = vmul.f32 %v1696_v58, %v236_v36 }
 0x190   :  { %v311_v25 = vpop.permute.xlu1 %310  ;;  %v309_v10 = vpop.permute.xlu0 %308  ;;  %v561_v61 = vrot.slane %v451_v19, 4  ;;  %v562_v2 = vrot.slane %v452_v56, 4  ;;  %v599_v35 = vsel %vm584_vm6, %v595_v42, %v560_v32 }
 0x191   :  { %v1800_v45 = vsel %vm314_vm5, %v307_v18, %v309_v10  ;;  %v1808_v16 = vsel %vm314_vm5, %v309_v10, %v311_v25 }
 0x192   :  { %v343_v7 = vmul.f32 %v1707_v0, %v1800_v45  ;;  %v344_v15 = vmul.f32 %v1713_v3, %v1808_v16  ;;  %v600_v19 = vsel %vm584_vm6, %v596_v37, %v561_v61  ;;  %v601_v34 = vsel %vm584_vm6, %v597_v51, %v562_v2 }
 0x194   :  { %v347_v14 = vpop.permute.xlu1 %346  ;;  %v313_v63 = vpop.permute.xlu0 %312  ;;  %v524_v32 = vrot.slane %v343_v7, 4 }
 0x195   :  { %v1812_v21 = vsel %vm314_vm5, %v313_v63, %v307_v18  ;;  %v1817_v6 = vsel %vm314_vm5, %v311_v25, %v313_v63  ;;  %v580_v18 = vsel %vm579_vm4, %v262_v39, %v511_v44 }
 0x196   :  { %v342_v56 = vmul.f32 %v1720_v5, %v1812_v21  ;;  %v345_v10 = vmul.f32 %v1727_v8, %v1817_v6  ;;  %v525_v8 = vrot.slane %v344_v15, 4 }
 0x198   :  { %v269_v25 = vpop.permute.xlu1 %268  ;;  %v349_v63 = vpop.permute.xlu0 %348  ;;  %v526_v37 = vrot.slane %v345_v10, 4 }
 0x199   :  { %v276_v36 = vsel %vm274_vm1, %v269_v25, %v1629_v23  ;;  %v277_v12 = vsel %vm274_vm1, %v1631_v24, %v269_v25  ;;  %v357_v44 = vsel %vm354_vm7, %v347_v14, %v349_v63  ;;  %v523_v24 = vrot.slane %v342_v56, 4 }
 0x19a   :  { %v303_v28 = vmul.f32 %v1741_v13, %v277_v12  ;;  %v304_v42 = vmul.f32 %v1747_v22, %v276_v36  ;;  %v476_v39 = vmul.f32 %v1750_v26, %v277_v12  ;;  %v477_v23 = vmul.f32 %v1757_v38, %v276_v36 }
 0x19b   :  { %v383_v58 = vmul.f32 %v1777_v1, %v357_v44 }
 0x19c   :  { %v512_v25 = vrot.slane %v303_v28, 6  ;;  %v513_v5 = vrot.slane %v304_v42, 6  ;;  %v351_v3 = vpop.permute.xlu1 %350  ;;  %v353_v57 = vpop.permute.xlu0 %352  ;;  %v572_v61 = vrot.slane %v477_v23, 2  ;;  %v571_v56 = vrot.slane %v476_v39, 2 }
 0x19d   :  { %v356_v62 = vsel %vm354_vm7, %v349_v63, %v351_v3  ;;  %v355_v51 = vsel %vm354_vm7, %v351_v3, %v353_v57  ;;  %v536_v36 = vrot.slane %v383_v58, 2  ;;  %v358_v12 = vsel %vm354_vm7, %v353_v57, %v347_v14 }
 0x19e   :  { %v581_v2 = vsel %vm579_vm4, %v263_v59, %v512_v25  ;;  %v582_v7 = vsel %vm579_vm4, %v264_v17, %v513_v5  ;;  %v384_v15 = vmul.f32 %v1780_v11, %v356_v62  ;;  %v385_v10 = vmul.f32 %v1786_v60, %v355_v51 }
 0x19f   :  { %v586_v44 = vsel %vm584_vm6, %v581_v2, %v524_v32  ;;  %v382_v63 = vmul.f32 %v1783_v55, %v358_v12  ;;  %v603_v59 = vsel %vm589_vm8, %v599_v35, %v572_v61  ;;  %v2164_v5 = vrot.slane %v1761_v46, 6 }
 0x1a0   :  { %v537_v28 = vrot.slane %v384_v15, 2  ;;  %v591_v3 = vsel %vm589_vm8, %v586_v44, %v536_v36  ;;  %v587_v62 = vsel %vm584_vm6, %v582_v7, %v525_v8  ;;  %v538_v17 = vrot.slane %v385_v10, 2 }
 0x1a1   :  { %v583_v58 = vsel %vm579_vm4, %v265_v27, %v2164_v5  ;;  %v1370_v42 = vpack.c.bf16 %v603_v59, %v591_v3  ;;  %v535_v14 = vrot.slane %v382_v63, 2  ;;  %v2165_v39 = vrot.slane %v1764_v33, 2  ;;  %v964_v63 = vld [vmem:[%s2133_s7] sm:$0x3] }
 0x1a2   :  { %v592_v57 = vsel %vm589_vm8, %v587_v62, %v537_v28  ;;  %v588_v32 = vsel %vm584_vm6, %v583_v58, %v526_v37  ;;  %v585_v25 = vsel %vm584_vm6, %v580_v18, %v523_v24  ;;  %v2166_v27 = vrot.slane %v1767_v50, 2  ;;  %v1132_v3 = vld [vmem:[#allocation2] sm:$0x1] }
 0x1a3   :  { %v604_v23 = vsel %vm589_vm8, %v600_v19, %v2165_v39  ;;  %1371 = vmatprep.subr.bf16.mxu0 %v1370_v42  ;;  %v593_v46 = vsel %vm589_vm8, %v588_v32, %v538_v17  ;;  %v602_v61 = vsel %vm589_vm8, %v598_v20, %v571_v56  ;;  %v590_v51 = vsel %vm589_vm8, %v585_v25, %v535_v14 }
 0x1a4   :  { %v605_v8 = vsel %vm589_vm8, %v601_v34, %v2166_v27  ;;  %v1376_v35 = vpack.c.bf16 %v604_v23, %v592_v57  ;;  %v1879_v33 = vrot.slane %v1684_v54, %v1640_v30  ;;  %v1883_v18 = vrot.slane %v1684_v54, %v1643_v31  ;;  %v606_v54 = vld [vmem:[%s2130_s4] sm:$0x3] }
 0x1a5   :  { %v1374_v2 = vpack.c.bf16 %v605_v8, %v593_v46  ;;  %v1372_v19 = vpack.c.bf16 %v602_v61, %v590_v51  ;;  %v504_v50 = vmul.f32 %v1717_v4, %v1808_v16  ;;  %v506_v34 = vmul.f32 %v1731_v9, %v1812_v21 }
 0x1a6   :  { %v503_v20 = vmul.f32 %v1879_v33, %v1800_v45  ;;  %v505_v31 = vmul.f32 %v1883_v18, %v1817_v6  ;;  %v2167_v16 = vmov 0.0  }
 0x1a7   :  { %1375 = vmatprep.subr.bf16.mxu1 %v1374_v2  ;;  %1373 = vmatpush1.bf16.msra.mxu0 %v1372_v19 }
 0x1a8   :  { %1377 = vmatpush1.bf16.msra.mxu1 %v1376_v35  ;;  %1352 = vmatprep.subr.msk.mxu0 %vm579_vm4, %v504_v50 }
 0x1a9   :  { %1355 = vmatprep.subr.msk.mxu1 %vm579_vm4, %v506_v34 }
 0x1ab   :  { %1353 = vmatpush1.msk.msra.mxu0 %vm579_vm4, %v503_v20 }
 0x1ac   :  { %1356 = vmatpush1.msk.msra.mxu1 %vm579_vm4, %v505_v31  ;;  %1354 = vmatmul.mubr.msk.f32.vlgmr.msra.gmra.mrb[2].mxu0 %vm613_vm9, %v606_v54 }
 0x1ad   :  { %1357 = vmatmul.mubr.msk.f32.vlgmr.msra.gmra.mrb[2].mxu1 %vm613_vm9, %v606_v54  ;;  %1049 = vmatprep.mubr.f32.mxu0 %v2167_v16  ;;  %v611_v45 = vpop.permute.xlu1 %610 }
 0x1ae   :  { %1120 = vmatprep.mubr.f32.mxu1 %v2167_v16 }
 0x27f   :  { %v695_v21 = vpop.f32.mrb[2].mxu0 }
 0x280   :  { %v766_v6 = vpop.f32.mrb[2].mxu1  ;;  %v696_v24 = vadd.f32 %v695_v21, %v611_v45  ;;  %v697_v37 = vpop.f32.mrb[3].mxu0 }
 0x281   :  { %v768_v7 = vpop.f32.mrb[3].mxu1  ;;  %v698_v36 = vadd.f32 %v697_v37, %v611_v45  ;;  %v767_v56 = vadd.f32 %v766_v6, %v611_v45  ;;  %v2168_v37 = vld [vmem:[#allocation13_spill] sm:$0xff] }
 0x282   :  { %v1904_v15 = vmax.f32 %v696_v24, 0.0  ;;  %v769_v10 = vadd.f32 %v768_v7, %v611_v45 }
 0x283   :  { %v1906_v12 = vmax.f32 %v698_v36, 0.0  ;;  %v1912_v44 = vmax.f32 %v767_v56, 0.0 }
 0x284   :  { %791 = vrot.lane.b32.xlu0 %v1904_v15, %s1479_s2  ;;  %v1914_v28 = vmax.f32 %v769_v10, 0.0 }
 0x285   :  { %793 = vrot.lane.b32.xlu1 %v1906_v12, %s1479_s2 }
 0x288   :  { %795 = vrot.lane.b32.xlu0 %v1912_v44, %s1479_s2 }
 0x289   :  { %797 = vrot.lane.b32.xlu1 %v1914_v28, %s1479_s2 }
 0x28c   :  { %839 = vrot.lane.b32.xlu0 %v1904_v15, %s1480_s3 }
 0x28d   :  { %841 = vrot.lane.b32.xlu1 %v1906_v12, %s1480_s3 }
 0x290   :  { %843 = vrot.lane.b32.xlu0 %v1912_v44, %s1480_s3 }
 0x291   :  { %845 = vrot.lane.b32.xlu1 %v1914_v28, %s1480_s3 }
 0x294   :  { %775 = vrot.lane.b32.xlu0 %v1904_v15, %s1481_s22 }
 0x295   :  { %777 = vrot.lane.b32.xlu1 %v1906_v12, %s1481_s22 }
 0x298   :  { %779 = vrot.lane.b32.xlu0 %v1912_v44, %s1481_s22 }
 0x299   :  { %781 = vrot.lane.b32.xlu1 %v1914_v28, %s1481_s22 }
 0x29c   :  { %807 = vrot.lane.b32.xlu0 %v1904_v15, %s1482_s23 }
 0x29d   :  { %809 = vrot.lane.b32.xlu1 %v1906_v12, %s1482_s23 }
 0x2a0   :  { %811 = vrot.lane.b32.xlu0 %v1912_v44, %s1482_s23 }
 0x2a1   :  { %813 = vrot.lane.b32.xlu1 %v1914_v28, %s1482_s23 }
 0x2a4   :  { %823 = vrot.lane.b32.xlu0 %v1904_v15, %s1483_s9 }
 0x2a5   :  { %825 = vrot.lane.b32.xlu1 %v1906_v12, %s1483_s9 }
 0x2a8   :  { %827 = vrot.lane.b32.xlu0 %v1912_v44, %s1483_s9 }
 0x2a9   :  { %829 = vrot.lane.b32.xlu1 %v1914_v28, %s1483_s9 }
 0x2ac   :  { %967 = vperm.xlu0 %1399, %v964_v63   ;;  %v2170_v63 = vld [vmem:[#allocation15_spill] sm:$0xff] }
 0x2ad   :  { %1135 = vperm.xlu1 %1400, %v1132_v3  }
 0x2f6   :  { %v792_v59 = vpop.permute.xlu0 %791 }
 0x2f7   :  { %v794_v5 = vpop.permute.xlu1 %793 }
 0x2f8   :  { %v801_v39 = vsel %vm274_vm1, %v792_v59, %v794_v5 }
 0x2f9   :  { %v1962_v27 = vmul.f32 %v801_v39, %v1741_v13  ;;  %v1971_v2 = vmul.f32 %v801_v39, %v1750_v26 }
 0x2fa   :  { %v796_v58 = vpop.permute.xlu0 %795 }
 0x2fb   :  { %v798_v62 = vpop.permute.xlu1 %797  ;;  %v800_v25 = vsel %vm274_vm1, %v794_v5, %v796_v58  ;;  %v931_v24 = vrot.slane %v1971_v2, 2 }
 0x2fc   :  { %v799_v8 = vsel %vm274_vm1, %v796_v58, %v798_v62  ;;  %v802_v35 = vsel %vm274_vm1, %v798_v62, %v792_v59  ;;  %v805_v13 = vmul.f32 %v800_v25, %v1747_v22  ;;  %v1977_v34 = vmul.f32 %v800_v25, %v1757_v38 }
 0x2fd   :  { %v803_v54 = vmul.f32 %v802_v35, %v1653_v40  ;;  %v1984_v45 = vmul.f32 %v799_v8, %v1656_v41  ;;  %v872_v22 = vrot.slane %v1962_v27, 6  ;;  %v1991_v38 = vmul.f32 %v802_v35, %v1662_v43  ;;  %v2169_v41 = vld [vmem:[#allocation14_spill] sm:$0xff] }
 0x2fe   :  { %v840_v17 = vpop.permute.xlu0 %839  ;;  %v1996_v40 = vmul.f32 %v799_v8, %v2168_v37  ;;  %v873_v56 = vrot.slane %v805_v13, 6 }
 0x2ff   :  { %v842_v42 = vpop.permute.xlu1 %841  ;;  %v871_v59 = vrot.slane %v803_v54, 6  ;;  %v874_v5 = vrot.slane %v1984_v45, 6  ;;  %v934_v62 = vrot.slane %v1991_v38, 2  ;;  %v2175_v45 = vld [vmem:[#allocation21_spill] sm:$0xff]  ;;  %v963_v38 = vld [vmem:[%s2132_s6] sm:$0x3] }
 0x300   :  { %v849_v46 = vsel %vm394_vm2, %v840_v17, %v842_v42 }
 0x301   :  { %v851_v20 = vmul.f32 %v849_v46, %v1666_v47 }
 0x302   :  { %v844_v57 = vpop.permute.xlu0 %843 }
 0x303   :  { %v846_v14 = vpop.permute.xlu1 %845  ;;  %v848_v61 = vsel %vm394_vm2, %v842_v42, %v844_v57  ;;  %v907_v10 = vrot.slane %v851_v20, 6  ;;  %v2171_v42 = vld [vmem:[#allocation16_spill] sm:$0xff] }
 0x304   :  { %v847_v19 = vsel %vm394_vm2, %v844_v57, %v846_v14  ;;  %v850_v31 = vsel %vm394_vm2, %v846_v14, %v840_v17  ;;  %v852_v26 = vmul.f32 %v848_v61, %v1669_v48 }
 0x305   :  { %v853_v47 = vmul.f32 %v847_v19, %v1672_v49  ;;  %v854_v7 = vmul.f32 %v850_v31, %v2169_v41  ;;  %v932_v49 = vrot.slane %v1977_v34, 2  ;;  %v951_v35 = vsel %vm579_vm4, %v1904_v15, %v907_v10  ;;  %v2173_v15 = vld [vmem:[#allocation17_spill] sm:$0xff] }
 0x306   :  { %v776_v32 = vpop.permute.xlu0 %775  ;;  %v908_v58 = vrot.slane %v852_v26, 6 }
 0x307   :  { %v778_v23 = vpop.permute.xlu1 %777  ;;  %v909_v17 = vrot.slane %v853_v47, 6 }
 0x308   :  { %v785_v21 = vsel %vm235_vm3, %v776_v32, %v778_v23 }
 0x309   :  { %v855_v3 = vmul.f32 %v785_v21, %v2170_v63  ;;  %v788_v61 = vmul.f32 %v785_v21, %v1679_v52  ;;  %v2174_v52 = vld [vmem:[#allocation20_spill] sm:$0xff] }
 0x30a   :  { %v780_v51 = vpop.permute.xlu0 %779 }
 0x30b   :  { %v782_v50 = vpop.permute.xlu1 %781  ;;  %v784_v48 = vsel %vm235_vm3, %v778_v23, %v780_v51  ;;  %v910_v23 = vrot.slane %v854_v7, 6  ;;  %v919_v19 = vrot.slane %v855_v3, 4  ;;  %v940_v7 = vsel %vm579_vm4, %v788_v61, %v872_v22  ;;  %v2178_v3 = vld [vmem:[#allocation18_spill] sm:$0xff] }
 0x30c   :  { %v856_v57 = vmul.f32 %v784_v48, %v2171_v42  ;;  %v783_v14 = vsel %vm235_vm3, %v780_v51, %v782_v50  ;;  %v786_v25 = vsel %vm235_vm3, %v782_v50, %v776_v32  ;;  %v952_v32 = vsel %vm579_vm4, %v1906_v12, %v908_v58  ;;  %v2172_v50 = vld [vmem:[#allocation19_spill] sm:$0xff] }
 0x30d   :  { %v857_v13 = vmul.f32 %v783_v14, %v2172_v50  ;;  %v787_v31 = vmul.f32 %v786_v25, %v2173_v15  ;;  %v858_v54 = vmul.f32 %v786_v25, %v2174_v52  ;;  %v953_v12 = vsel %vm579_vm4, %v1912_v44, %v909_v17 }
 0x30e   :  { %v808_v6 = vpop.permute.xlu0 %807  ;;  %v920_v20 = vrot.slane %v856_v57, 4  ;;  %v790_v58 = vmul.f32 %v783_v14, %v2178_v3 }
 0x30f   :  { %v810_v36 = vpop.permute.xlu1 %809  ;;  %v922_v42 = vrot.slane %v858_v54, 4  ;;  %v939_v57 = vsel %vm579_vm4, %v787_v31, %v871_v59 }
 0x310   :  { %v2004_v43 = vsel %vm314_vm5, %v808_v6, %v810_v36 }
 0x311   :  { %v820_v46 = vmul.f32 %v2004_v43, %v1707_v0  ;;  %v789_v0 = vmul.f32 %v784_v48, %v1682_v53  ;;  %v954_v53 = vsel %vm579_vm4, %v1914_v28, %v910_v23  ;;  %v955_v48 = vsel %vm584_vm6, %v951_v35, %v919_v19 }
 0x312   :  { %v812_v39 = vpop.permute.xlu0 %811  ;;  %v921_v28 = vrot.slane %v857_v13, 4  ;;  %v956_v23 = vsel %vm584_vm6, %v952_v32, %v920_v20  ;;  %v942_v13 = vsel %vm579_vm4, %v790_v58, %v874_v5  ;;  %v863_v2 = vmul.f32 %v2004_v43, %v1879_v33 }
 0x313   :  { %v2018_v27 = vsel %vm314_vm5, %v810_v36, %v812_v39  ;;  %v814_v8 = vpop.permute.xlu1 %813  ;;  %v884_v47 = vrot.slane %v820_v46, 4  ;;  %v2177_v36 = vld [vmem:[#allocation23_spill] sm:$0xff]  ;;  %v941_v44 = vsel %vm579_vm4, %v789_v0, %v873_v56  ;;  %v960_v50 = vsel %vm589_vm8, %v956_v23, %v932_v49  ;;  %v2179_v23 = vld [vmem:[#allocation12_spill] sm:$0xff] }
 0x314   :  { %v2025_v51 = vsel %vm314_vm5, %v814_v8, %v808_v6  ;;  %v2033_v34 = vsel %vm314_vm5, %v812_v39, %v814_v8  ;;  %v821_v26 = vmul.f32 %v2018_v27, %v2175_v45  ;;  %v2176_v6 = vld [vmem:[#allocation22_spill] sm:$0xff]  ;;  %v957_v31 = vsel %vm584_vm6, %v953_v12, %v921_v28 }
 0x315   :  { %v819_v37 = vmul.f32 %v2025_v51, %v2176_v6  ;;  %v822_v10 = vmul.f32 %v2033_v34, %v2177_v36  ;;  %v944_v56 = vsel %vm584_vm6, %v940_v7, %v884_v47  ;;  %v864_v6 = vmul.f32 %v2018_v27, %v1717_v4 }
 0x316   :  { %v824_v21 = vpop.permute.xlu0 %823  ;;  %v885_v39 = vrot.slane %v821_v26, 4  ;;  %v959_v26 = vsel %vm589_vm8, %v955_v48, %v931_v24  ;;  %v865_v4 = vmul.f32 %v2033_v34, %v1883_v18 }
 0x317   :  { %v826_v41 = vpop.permute.xlu1 %825  ;;  %v883_v25 = vrot.slane %v819_v37, 4  ;;  %v886_v61 = vrot.slane %v822_v10, 4  ;;  %v1131_v10 = vld [vmem:[%s2134_s8] sm:$0x1]  ;;  %s1485_s8 = smov [#allocation8]  }
 0x318   :  { %v833_v63 = vsel %vm354_vm7, %v824_v21, %v826_v41  ;;  %v945_v52 = vsel %vm584_vm6, %v941_v44, %v885_v39  ;;  %s1340_s30 = sshll.u32 %s1485_s8, 4  ;;  %s1341_s30 = int_to_ptr.vmem [resolvable:$true] %s1340_s30 }
 0x319   :  { %v836_v17 = vmul.f32 %v833_v63, %v1777_v1  ;;  %v946_v49 = vsel %vm584_vm6, %v942_v13, %v886_v61  ;;  %s1445_s11 = scalar_lea.vmem %s1341_s30, 64  ;;  %p1450_p3 = scmp.lt.s32.totalorder %s1341_s30, %s1341_s30 }
 0x31a   :  { %v828_v22 = vpop.permute.xlu0 %827  ;;  %p1446_p2 = scmp.ne.s32.totalorder %s1341_s30, %s1445_s11  ;;  %p1451_p4 = scmp.lt.s32.totalorder %s1445_s11, %s1445_s11 }
 0x31b   :  { %v896_v46 = vrot.slane %v836_v17, 2  ;;  %v832_v8 = vsel %vm354_vm7, %v826_v41, %v828_v22  ;;  %v830_v35 = vpop.permute.xlu1 %829  ;;  %v866_v41 = vmul.f32 %v2025_v51, %v1731_v9 }
 0x31c   :  { %v837_v14 = vmul.f32 %v832_v8, %v1780_v11  ;;  %v831_v1 = vsel %vm354_vm7, %v828_v22, %v830_v35  ;;  %v834_v59 = vsel %vm354_vm7, %v830_v35, %v824_v21  ;;  %v958_v11 = vsel %vm584_vm6, %v954_v53, %v922_v42  ;;  %p1452_p5 = por %p1451_p4, %p1450_p3 }
 0x31d   :  { %v835_v19 = vmul.f32 %v834_v59, %v1783_v55  ;;  %v838_v32 = vmul.f32 %v831_v1, %v1786_v60  ;;  %v948_v0 = vsel %vm589_vm8, %v944_v56, %v896_v46  ;;  %v933_v55 = vrot.slane %v1996_v40, 2 }
 0x31e   :  { %v897_v20 = vrot.slane %v837_v14, 2  ;;  %v1378_v15 = vpack.c.bf16 %v960_v50, %v948_v0  ;;  %v943_v60 = vsel %vm584_vm6, %v939_v57, %v883_v25  ;;  %v962_v12 = vsel %vm589_vm8, %v958_v11, %v934_v62  ;;  %p1453_p6 = pnand %p1452_p5, %p1446_p2 }
 0x31f   :  { %v895_v29 = vrot.slane %v835_v19, 2  ;;  %v898_v54 = vrot.slane %v838_v32, 2  ;;  %v961_v47 = vsel %vm589_vm8, %v957_v31, %v933_v55  ;;  %v2180_v19 = vlaneseq }
 0x320   :  { %v949_v45 = vsel %vm589_vm8, %v945_v52, %v897_v20  ;;  %1379 = vmatprep.subr.bf16.mxu0 %v1378_v15 }
 0x321   :  { %v947_v5 = vsel %vm589_vm8, %v943_v60, %v895_v29  ;;  %v950_v21 = vsel %vm589_vm8, %v946_v49, %v898_v54  ;;  %v1384_v37 = vpack.c.bf16 %v961_v47, %v949_v45  ;;  %vm1331_vm11 = vcmp.lt.s32.totalorder %v2180_v19, 512 }
 0x322   :  { %v1380_v40 = vpack.c.bf16 %v959_v26, %v947_v5  ;;  %v1382_v53 = vpack.c.bf16 %v962_v12, %v950_v21 }
 0x324   :  { %1381 = vmatpush1.bf16.msra.mxu0 %v1380_v40  ;;  %1383 = vmatprep.subr.bf16.mxu1 %v1382_v53 }
 0x325   :  { %1358 = vmatprep.subr.msk.mxu0 %vm579_vm4, %v864_v6  ;;  %1385 = vmatpush1.bf16.msra.mxu1 %v1384_v37 }
 0x326   :  { %1361 = vmatprep.subr.msk.mxu1 %vm579_vm4, %v866_v41 }
 0x328   :  { %1359 = vmatpush1.msk.msra.mxu0 %vm579_vm4, %v863_v2 }
 0x329   :  { %1360 = vmatmul.mubr.msk.f32.vlgmr.msra.gmra.mrb[4].mxu0 %vm613_vm9, %v963_v38  ;;  %1362 = vmatpush1.msk.msra.mxu1 %vm579_vm4, %v865_v4 }
 0x32a   :  { %1363 = vmatmul.mubr.msk.f32.vlgmr.msra.gmra.mrb[4].mxu1 %vm613_vm9, %v963_v38  ;;  %1222 = vmatprep.mubr.f32.mxu0 %v2167_v16 }
 0x32b   :  { %1293 = vmatprep.mubr.f32.mxu1 %v2167_v16  ;;  %v968_v9 = vpop.permute.xlu0 %967  ;;  %v1484_v16 = vmov 1966171168  }
 0x32c   :  { %v1307_v44 = vunpack.c.l.s4 %v1484_v16  ;;  %v1136_v3 = vpop.permute.xlu1 %1135 }
 0x32d   :  { %v1141_v28 = vrot.slane %v1136_v3, %v1640_v30 }
 0x32e   :  { %v1308_v58 = vunpack.c.0.s8 %v1307_v44 }
 0x330   :  { %v1311_v25 = vsub.s32 %v1308_v58, %v2179_v23 }
 0x3fc   :  { %v1051_v33 = vpop.f32.mrb[4].mxu0 }
 0x3fd   :  { %v1052_v24 = vadd.f32 %v1051_v33, %v968_v9  ;;  %v1053_v43 = vpop.f32.mrb[5].mxu0  ;;  %v1122_v62 = vpop.f32.mrb[4].mxu1 }
 0x3fe   :  { %v1054_v27 = vadd.f32 %v1053_v43, %v968_v9  ;;  %v1123_v51 = vadd.f32 %v1122_v62, %v968_v9  ;;  %v1124_v18 = vpop.f32.mrb[5].mxu1 }
 0x3ff   :  { %v1125_v34 = vadd.f32 %v1124_v18, %v968_v9  ;;  %v1127_v48 = vmax.f32 %v1052_v24, 0.0 }
 0x400   :  { %v1128_v7 = vmax.f32 %v1054_v27, 0.0  ;;  %v1129_v63 = vmax.f32 %v1123_v51, 0.0 }
 0x401   :  { %v1130_v36 = vmax.f32 %v1125_v34, 0.0 }
 0x402   :  { %1364 = vmatprep.subr.msk.mxu0 %vm579_vm4, %v1128_v7 }
 0x403   :  { %1365 = vmatpush1.msk.msra.mxu0 %vm579_vm4, %v1127_v48  ;;  %1367 = vmatprep.subr.msk.mxu1 %vm579_vm4, %v1130_v36 }
 0x404   :  { %1366 = vmatmul.mubr.msk.f32.vlgmr.msra.gmra.mrb[6].mxu0 %vm1142_vm10, %v1131_v10  ;;  %1368 = vmatpush1.msk.msra.mxu1 %vm579_vm4, %v1129_v63 }
 0x405   :  { %1369 = vmatmul.mubr.msk.f32.vlgmr.msra.gmra.mrb[6].mxu1 %vm1142_vm10, %v1131_v10 }
 0x4d7   :  { %v1224_v17 = vpop.f32.mrb[6].mxu0 }
 0x4d8   :  { %v1225_v42 = vadd.f32 %v1224_v17, %v1141_v28  ;;  %v1226_v57 = vpop.f32.mrb[7].mxu0  ;;  %v1295_v39 = vpop.f32.mrb[6].mxu1 }
 0x4d9   :  { %v1227_v22 = vadd.f32 %v1226_v57, %v1141_v28  ;;  %v1296_v46 = vadd.f32 %v1295_v39, %v1141_v28  ;;  %v1297_v8 = vpop.f32.mrb[7].mxu1 }
 0x4da   :  { %v1298_v35 = vadd.f32 %v1297_v8, %v1141_v28 }
 0x4db   :  { %v1304_v56 = vcombine.low %v1225_v42, %v1227_v22 }
 0x4dc   :  { %v1305_v61 = vcombine.low %v1296_v46, %v1298_v35 }
 0x4dd   :  { %v1312_v14 = vrot.slane %v1304_v56, %v1311_v25 }
 0x4de   :  { %v1319_v1 = vrot.slane %v1305_v61, %v1311_v25 }
 0x4e0   :  { %v1320_v59 = vcombine.low %v1312_v14, %v1319_v1 }
 0x4e2   :  { %v1327_v30 = vrot.slane %v1320_v59, %v1311_v25 }
 0x4e4   :  { %1333 = vst.msk [vmem:[#allocation8] sm:$0xf] %vm1331_vm11, %v1327_v30 }
 0x4e5   :  { %1456 = shalt.err (!%p1453_p6)
}
 0x4e6   :  { %s1457_s14 = scalar_lea.hbm %s2136_s10, 64 }
 0x4e7   :  { %p1458_p7 = scmp.ne.s32.totalorder %s2136_s10, %s1457_s14  ;;  %p1461_p8 = scmp.lt.u32.totalorder %s1457_s14, %s2136_s10 }
 0x4e9   :  { %p1463_p9 = pnand %p1461_p8, %p1458_p7 }
 0x4eb   :  { %1466 = shalt.err (!%p1463_p9)
}
 0x4ec   :  { %1343 = dma.vmem_to_hbm [thread:$0]  %s1341_s30, 64, %s2136_s10, [#allocation5]  }
 0x4ed   :  { %1471 = dma.done.wait [#allocation5], 64  }
 0x4ee   :  { %1472 = vsyncadd [#allocation5], 4294967232 }
 0x4ef   :  { %1347 = vsyncpa [#allocation4], 1 }
 0x4f0   :  { %1348 = vsyncpa [#allocation7], 1 }
 0x4f1   :  { %1349 = vsyncpa [#allocation5], 1 }

</bundles_post_ra>
